<compile_context>
chip_gen: v7x
topology: tpu7x:2x2x1
jax: 0.10.0
libtpu: 0.0.40
codegen_flags: <defaults>
</compile_context>

<pallas_src>
import functools
import math

import jax
import jax.numpy as jnp
from jax.experimental import pallas as pl
from jax.experimental.pallas import tpu as pltpu

_HALF_LOG_2PI = 0.5 * math.log(2.0 * math.pi)


def _std_normal_logprob_kernel(z_ref, lp_ref, *, d_z):
    # z tile: (TB, D).  Upcast (bf16 -> f32 if needed) for the arithmetic,
    # square on the VPU, lane-reduce on the XLU, add the folded constant once
    # per row (after the reduce, not per element).
    z = z_ref[...].astype(jnp.float32)
    ssq = jnp.sum(z * z, axis=-1, keepdims=True)            # (TB, 1)
    lp_ref[...] = -0.5 * ssq - (d_z * _HALF_LOG_2PI)


def _pick_tile_rows(batch, d, itemsize):
    """Rows per tile: ~4 MiB per input buffer (x2 double-buffered), sublane-friendly."""
    target_bytes = 4 << 20
    tb = target_bytes // max(1, d * itemsize)
    tb = (int(tb) // 16) * 16          # multiple of 16 covers f32 and bf16 packing
    tb = max(16, min(tb, 4096))
    return batch if batch <= tb else tb


def standard_normal_log_prob(z):
    """log_prob of Independent(Normal(0, 1), 1) evaluated at z.

    z: (B, D) float32 or bfloat16
    returns (B,) float32
    """
    B, D = z.shape
    tb = _pick_tile_rows(B, D, z.dtype.itemsize)
    grid = (pl.cdiv(B, tb),)
    kernel = functools.partial(_std_normal_logprob_kernel, d_z=D)

    lp = pl.pallas_call(
        kernel,
        out_shape=jax.ShapeDtypeStruct((B, 1), jnp.float32),
        grid_spec=pltpu.PrefetchScalarGridSpec(
            num_scalar_prefetch=0,
            grid=grid,
            in_specs=[pl.BlockSpec((tb, D), lambda i: (i, 0))],
            out_specs=pl.BlockSpec((tb, 1), lambda i: (i, 0)),
        ),
        compiler_params=pltpu.CompilerParams(
            dimension_semantics=("parallel",)),
        cost_estimate=pl.CostEstimate(
            flops=3 * B * D,
            transcendentals=0,
            bytes_accessed=B * D * z.dtype.itemsize + B * 4),
    )(z)
    return lp[:, 0]


class _StandardNormalPriorDist:
    """Lightweight stand-in for td.Independent(td.Normal(mu, scale), 1).

    Matches the PyTorch module exactly: `var` is used as the Normal *scale*
    (std), not the variance.  For NormalPrior, mu == 0 and scale == 1, so
    log_prob folds to -0.5*sum(z^2) - d_z*0.5*log(2*pi) (computed in Pallas).
    """

    def __init__(self, mu, scale):
        self.mu = mu
        self.scale = scale

    def log_prob(self, z):
        return standard_normal_log_prob(z)

    def sample(self, key, sample_shape=()):
        # Standard-normal sampling; exact for mu=0, scale=1 (not a Pallas op).
        shape = tuple(sample_shape) + self.mu.shape
        eps = jax.random.normal(key, shape, dtype=jnp.float32)
        return self.mu + self.scale * eps

    rsample = sample


class NormalPrior:
    """JAX/Pallas port of the PyTorch NormalPrior module."""

    def __init__(self, d_z):
        self.d_z = d_z
        # Deterministic parameter init, exactly as the PyTorch module:
        # mu = zeros(d_z), var (used as scale) = ones(d_z); not trainable.
        self.mu = jnp.zeros((d_z,), dtype=jnp.float32)
        self.var = jnp.ones((d_z,), dtype=jnp.float32)

    def forward(self):
        # Return the prior "distribution" (log_prob backed by the Pallas kernel).
        return _StandardNormalPriorDist(self.mu, self.var)

    __call__ = forward


def _reference_log_prob(z, mu, scale):
    z = z.astype(jnp.float32)
    elem = (-0.5 * ((z - mu) / scale) ** 2
            - jnp.log(scale) - 0.5 * math.log(2.0 * math.pi))
    return jnp.sum(elem, axis=-1)


if __name__ == "__main__":
    key = jax.random.PRNGKey(0)
    B, d_z = 8, 32
    z = jax.random.normal(key, (B, d_z), dtype=jnp.float32)

    prior = NormalPrior(d_z)
    dist = prior()                       # forward() -> distribution object

    # Small, module-consistent shape.
    lp = jax.block_until_ready(dist.log_prob(z))
    ref = _reference_log_prob(z, prior.mu, prior.var)
    assert lp.shape == (B,)
    assert jnp.allclose(lp, ref, atol=1e-5, rtol=1e-5), (lp, ref)

    # bf16 passthrough path (no wrapper upcast; kernel upcasts internally).
    z_bf16 = z.astype(jnp.bfloat16)
    lp_bf = jax.block_until_ready(standard_normal_log_prob(z_bf16))
    ref_bf = _reference_log_prob(z_bf16.astype(jnp.float32), prior.mu, prior.var)
    assert jnp.allclose(lp_bf, ref_bf, atol=1e-4, rtol=1e-5), (lp_bf, ref_bf)

    # Moderately larger shape to exercise the tiled, multi-step pipelined path.
    Bb, Db = 2048, 1024
    z_big = jax.random.normal(jax.random.PRNGKey(1), (Bb, Db), dtype=jnp.float32)
    lp_big = jax.block_until_ready(standard_normal_log_prob(z_big))
    ref_big = -0.5 * jnp.sum(z_big * z_big, axis=-1) - Db * _HALF_LOG_2PI
    assert lp_big.shape == (Bb,)
    assert jnp.allclose(lp_big, ref_big, atol=1e-3, rtol=1e-4)

    print("KERNEL_OK")
</pallas_src>

<mosaic_0001>
module attributes {stable_mosaic.version = 11 : i64} {
  func.func @_std_normal_logprob_kernel(%arg0: i32, %arg1: memref<8x32xf32, #tpu.memory_space<vmem>>, %arg2: memref<8x1xf32, #tpu.memory_space<vmem>>) attributes {dimension_semantics = [#tpu.dimension_semantics<parallel>], iteration_bounds = array<i64: 1>, scalar_prefetch = 0 : i64, scratch_operands = 0 : i64, tpu.core_type = #tpu.core_type<tc>, window_params = [{transform_indices = @transform_0, window_bounds = array<i64: 8, 32>}, {transform_indices = @transform_1, window_bounds = array<i64: 8, 1>}]} {
    %c0 = arith.constant 0 : index
    %c0_0 = arith.constant 0 : index
    %0 = vector.load %arg1[%c0, %c0_0] : memref<8x32xf32, #tpu.memory_space<vmem>>, vector<8x32xf32>
    %1 = arith.mulf %0, %0 : vector<8x32xf32>
    %cst = arith.constant dense<0.000000e+00> : vector<8xf32>
    %2 = vector.multi_reduction <add>, %1, %cst [1] : vector<8x32xf32> to vector<8xf32>
    %3 = vector.shape_cast %2 : vector<8xf32> to vector<8x1xf32>
    %cst_1 = arith.constant -5.000000e-01 : f32
    %4 = vector.broadcast %cst_1 : f32 to vector<8x1xf32>
    %5 = arith.mulf %4, %3 : vector<8x1xf32>
    %cst_2 = arith.constant 29.4060326 : f32
    %6 = vector.broadcast %cst_2 : f32 to vector<8x1xf32>
    %7 = arith.subf %5, %6 : vector<8x1xf32>
    %c0_3 = arith.constant 0 : index
    %c0_4 = arith.constant 0 : index
    %8 = vector.load %arg2[%c0_3, %c0_4] : memref<8x1xf32, #tpu.memory_space<vmem>>, vector<8x1xf32>
    tpu.vector_store %arg2[%c0_3, %c0_4], %7 {strides = array<i32>} : memref<8x1xf32, #tpu.memory_space<vmem>>, vector<8x1xf32>,
    return
  }
  func.func @transform_0(%arg0: i32) -> (i32, i32) {
    %c0_i32 = arith.constant 0 : i32
    %c0_i32_0 = arith.constant 0 : i32
    return %arg0, %c0_i32 : i32, i32
  }
  func.func @transform_1(%arg0: i32) -> (i32, i32) {
    %c0_i32 = arith.constant 0 : i32
    %c0_i32_0 = arith.constant 0 : i32
    return %arg0, %c0_i32 : i32, i32
  }
}

</mosaic_0001>

<bundles_post_ra>
// kernel: tpu_custom_call.1
= control target key start
LH: loop header
LB: loop body
LE: loop exit
PB: predicated region body
PF: predicated region fallthrough
CT: control target
= control target key end

     0   :  { %6 = vsyncpa [#allocation3], 0  ;;  %s61_s6 = smov [#allocation2]   ;;  %s87_s0 = inlined_call_operand.hbm [shape: f32[8,32], index: 0, kind: input, shape index: {}]   ;;  %s88_s1 = inlined_call_operand.vmem [shape: f32[8,1], index: 1, kind: output, shape index: {}]  }
   0x1   :  { %s13_s7 = sshll.u32 %s61_s6, 4  ;;  %s37_s10 = scalar_lea.hbm %s87_s0, 128  ;;  %s14_s7 = int_to_ptr.vmem [resolvable:$true] %s13_s7 }
   0x2   :  { %p38_p0 = scmp.ne.s32.totalorder %s87_s0, %s37_s10  ;;  %p41_p1 = scmp.lt.u32.totalorder %s37_s10, %s87_s0 }
   0x4   :  { %p43_p2 = pnand %p41_p1, %p38_p0 }
   0x6   :  { %46 = shalt.err (!%p43_p2)
}
   0x7   :  { %s47_s15 = scalar_lea.vmem %s14_s7, 128  ;;  %p52_p4 = scmp.lt.s32.totalorder %s14_s7, %s14_s7 }
   0x8   :  { %p48_p3 = scmp.ne.s32.totalorder %s14_s7, %s47_s15  ;;  %p53_p5 = scmp.lt.s32.totalorder %s47_s15, %s47_s15 }
   0xa   :  { %p54_p6 = por %p53_p5, %p52_p4 }
   0xc   :  { %p55_p7 = pnand %p54_p6, %p48_p3 }
   0xe   :  { %58 = shalt.err (!%p55_p7)
}
   0xf   :  { %16 = dma.hbm_to_vmem [thread:$0]  %s87_s0, 128, %s14_s7, [#allocation3]  }
  0x10   :  { %59 = dma.done.wait [#allocation3], 128  }
  0x11   :  { %60 = vsyncadd [#allocation3], 4294967168  ;;  %v20_v0 = vld [vmem:[#allocation2] sm:$0xff]  ;;  %vm22_vm0 = vcmask 261120   ;;  %vm28_vm1 = vcmask 7168  }
  0x12   :  { %v21_v1 = vmul.f32 %v20_v0, %v20_v0 }
  0x14   :  { %v23_v2 = vsel %vm22_vm0, %v21_v1, 0.0 }
  0x15   :  { %24 = vadd.xlane.f32.xlu0 %v23_v2 }
  0xa2   :  { %v25_v3 = vpop.xlane.xlu0 %24 }
  0xa3   :  { %v26_v4 = vmul.f32 -0.5, %v25_v3 }
  0xa5   :  { %v35_v5 = vadd.f32 -29.406033, %v26_v4 }
  0xa7   :  { %29 = vst.msk [vmem:[%s88_s1] sm:$0xff] %vm28_vm1, %v35_v5 }
  0xa8   :  { %34 = vsyncpa [#allocation3], 1 }

</bundles_post_ra>
